<compile_context>
chip_gen: v5e
topology: v5e:2x2
jax: 0.10.0
libtpu: 0.0.40
codegen_flags: <defaults>
</compile_context>

<pallas_src>
import jax
import jax.numpy as jnp
from jax.experimental import pallas as pl
from jax.experimental.pallas import tpu as pltpu


def _round_up(x, m):
    return ((x + m - 1) // m) * m


def cat_kernel(x_ref, w_ref, b_ref, o_ref):
    # x_ref: (nb, Cin, hw_tile)   w_ref: (Ctot, Cin)   b_ref: (Ctot, 1)
    # o_ref: (nb, Ctot, hw_tile)
    w = w_ref[...]
    bias = b_ref[...]
    for i in range(x_ref.shape[0]):        # nb is static -> unrolled
        y = jnp.dot(w, x_ref[i], preferred_element_type=jnp.float32)
        # single full-width, lane-dense store realizes the channel concat
        o_ref[i] = (y + bias).astype(o_ref.dtype)


def cat_forward(x_nchw, weights, biases, *,
                vmem_budget_bytes=20 * 2**20, max_images_per_step=8):
    """Fused CAT of B 1x1-conv branches.

    weights: (B, Cout_b, Cin)  -- torch Conv2d weight (Cout, Cin, 1, 1) squeezed
    biases:  (B, Cout_b)
    Returns NCHW output (N, B*Cout_b, H, W), equal to
    torch.cat([conv_i(x) for i in range(B)], dim=1).
    """
    N, C, H, W = x_nchw.shape
    Bn, Cout_b, Cin = weights.shape
    assert Cin == C
    Ctot = Bn * Cout_b
    HW = H * W
    itemsize = jnp.dtype(x_nchw.dtype).itemsize

    # torch.cat(dim=1) == stacking branch weight rows.
    w_fused = weights.reshape(Ctot, Cin).astype(x_nchw.dtype)
    b_fused = biases.reshape(Ctot, 1).astype(jnp.float32)

    # Pure reshape (no pad, no HBM transpose): pixels on lanes, channels on
    # sublanes.
    x3d = x_nchw.reshape(N, C, HW)

    # Lane columns per grid step from a VMEM budget:
    #   footprint ~ 2 (double buffer) * (Cin + Ctot) * lanes * itemsize.
    lane_cap = vmem_budget_bytes // (2 * (Cin + Ctot) * itemsize)
    lane_cap = max(128, (lane_cap // 128) * 128)

    hw_tile = min(_round_up(HW, 128), lane_cap)
    nb = max(1, min(N, lane_cap // hw_tile, max_images_per_step))

    # Keep >= 2 grid steps when there is enough work (v7x megacore sharding).
    if pl.cdiv(N, nb) * pl.cdiv(HW, hw_tile) < 2:
        if N >= 2:
            nb = (N + 1) // 2
        elif HW > 128:
            hw_tile = max(128, _round_up(pl.cdiv(HW, 2), 128))

    grid = (pl.cdiv(N, nb), pl.cdiv(HW, hw_tile))

    out3d = pl.pallas_call(
        cat_kernel,
        out_shape=jax.ShapeDtypeStruct((N, Ctot, HW), x_nchw.dtype),
        grid_spec=pltpu.PrefetchScalarGridSpec(
            num_scalar_prefetch=0,
            grid=grid,
            in_specs=[
                pl.BlockSpec((nb, Cin, hw_tile), lambda n, s: (n, 0, s)),
                # constant index_map -> weights/bias stay resident in VMEM
                pl.BlockSpec((Ctot, Cin), lambda n, s: (0, 0)),
                pl.BlockSpec((Ctot, 1), lambda n, s: (0, 0)),
            ],
            out_specs=pl.BlockSpec((nb, Ctot, hw_tile),
                                   lambda n, s: (n, 0, s)),
        ),
        compiler_params=pltpu.CompilerParams(
            dimension_semantics=("parallel", "parallel"),
            vmem_limit_bytes=32 * 2**20),
    )(x3d, w_fused, b_fused)

    # Pure reshape back to NCHW (no slice, no copy).
    return out3d.reshape(N, Ctot, H, W)


def _reference(x, weights, biases):
    return jnp.concatenate(
        [jnp.einsum("oc,nchw->nohw", weights[i], x)
         + biases[i][None, :, None, None]
         for i in range(weights.shape[0])],
        axis=1)


if __name__ == "__main__":
    key = jax.random.PRNGKey(0)
    N, C, H, W = 2, 4, 16, 16
    num_branches, cout_b = 3, 8

    k1, k2, k3 = jax.random.split(key, 3)
    x = jax.random.normal(k1, (N, C, H, W), jnp.float32)
    # Conv2d(C, cout_b, 1) weight is (cout_b, C, 1, 1); kept as (B, cout_b, C).
    weights = 0.1 * jax.random.normal(k2, (num_branches, cout_b, C), jnp.float32)
    biases = 0.1 * jax.random.normal(k3, (num_branches, cout_b), jnp.float32)

    out = jax.block_until_ready(cat_forward(x, weights, biases))
    ref = _reference(x, weights, biases)
    assert out.shape == (N, num_branches * cout_b, H, W)
    assert jnp.allclose(out, ref, atol=1e-5), "mismatch vs reference"

    # Exercise the masked-boundary path (HW not a multiple of 128).
    H2 = W2 = 20
    x2 = jax.random.normal(k1, (N, C, H2, W2), jnp.float32)
    out2 = jax.block_until_ready(cat_forward(x2, weights, biases))
    ref2 = _reference(x2, weights, biases)
    assert jnp.allclose(out2, ref2, atol=1e-5), "mismatch vs reference (masked tile)"

    print("KERNEL_OK")
</pallas_src>

<mosaic_0001>
module attributes {stable_mosaic.version = 11 : i64} {
  func.func @cat_kernel(%arg0: i32, %arg1: i32, %arg2: memref<1x4x256xf32, #tpu.memory_space<vmem>>, %arg3: memref<24x4xf32, #tpu.memory_space<vmem>>, %arg4: memref<24x1xf32, #tpu.memory_space<vmem>>, %arg5: memref<1x24x256xf32, #tpu.memory_space<vmem>>) attributes {dimension_semantics = [#tpu.dimension_semantics<parallel>, #tpu.dimension_semantics<parallel>], iteration_bounds = array<i64: 2, 1>, scalar_prefetch = 0 : i64, scratch_operands = 0 : i64, tpu.core_type = #tpu.core_type<tc>, window_params = [{transform_indices = @transform_0, window_bounds = array<i64: 1, 4, 256>}, {pipeline_mode = #tpu.pipeline_mode<synchronous>, transform_indices = @transform_1, window_bounds = array<i64: 24, 4>}, {pipeline_mode = #tpu.pipeline_mode<synchronous>, transform_indices = @transform_2, window_bounds = array<i64: 24, 1>}, {transform_indices = @transform_3, window_bounds = array<i64: 1, 24, 256>}]} {
    %c0 = arith.constant 0 : index
    %c0_0 = arith.constant 0 : index
    %0 = vector.load %arg3[%c0, %c0_0] : memref<24x4xf32, #tpu.memory_space<vmem>>, vector<24x4xf32>
    %c0_1 = arith.constant 0 : index
    %c0_2 = arith.constant 0 : index
    %1 = vector.load %arg4[%c0_1, %c0_2] : memref<24x1xf32, #tpu.memory_space<vmem>>, vector<24x1xf32>
    %c0_3 = arith.constant 0 : index
    %c0_4 = arith.constant 0 : index
    %c0_5 = arith.constant 0 : index
    %2 = vector.load %arg2[%c0_3, %c0_4, %c0_5] : memref<1x4x256xf32, #tpu.memory_space<vmem>>, vector<1x4x256xf32>
    %3 = vector.shape_cast %2 : vector<1x4x256xf32> to vector<4x256xf32>
    %cst = arith.constant dense<0.000000e+00> : vector<24x256xf32>
    %4 = tpu.matmul %0, %3, %cst {dimension_numbers = #tpu.dot_dimension_numbers<[1], [0], [0], [1], [0, 0, 1, 1], [], []>} : vector<24x4xf32>, vector<4x256xf32>, vector<24x256xf32> -> vector<24x256xf32>
    %5 = vector.broadcast %1 : vector<24x1xf32> to vector<24x256xf32>
    %6 = arith.addf %4, %5 : vector<24x256xf32>
    %c0_6 = arith.constant 0 : index
    %c0_7 = arith.constant 0 : index
    %c0_8 = arith.constant 0 : index
    %7 = vector.load %arg5[%c0_6, %c0_7, %c0_8] : memref<1x24x256xf32, #tpu.memory_space<vmem>>, vector<1x24x256xf32>
    %8 = vector.shape_cast %7 : vector<1x24x256xf32> to vector<24x256xf32>
    %9 = vector.shape_cast %6 : vector<24x256xf32> to vector<1x24x256xf32>
    tpu.vector_store %arg5[%c0_6, %c0_7, %c0_8], %9 {strides = array<i32>} : memref<1x24x256xf32, #tpu.memory_space<vmem>>, vector<1x24x256xf32>,
    return
  }
  func.func @transform_0(%arg0: i32, %arg1: i32) -> (i32, i32, i32) {
    %c0_i32 = arith.constant 0 : i32
    %c0_i32_0 = arith.constant 0 : i32
    return %arg0, %c0_i32, %arg1 : i32, i32, i32
  }
  func.func @transform_1(%arg0: i32, %arg1: i32) -> (i32, i32) {
    %c0_i32 = arith.constant 0 : i32
    %c0_i32_0 = arith.constant 0 : i32
    %c0_i32_1 = arith.constant 0 : i32
    return %c0_i32, %c0_i32_0 : i32, i32
  }
  func.func @transform_2(%arg0: i32, %arg1: i32) -> (i32, i32) {
    %c0_i32 = arith.constant 0 : i32
    %c0_i32_0 = arith.constant 0 : i32
    %c0_i32_1 = arith.constant 0 : i32
    return %c0_i32, %c0_i32_0 : i32, i32
  }
  func.func @transform_3(%arg0: i32, %arg1: i32) -> (i32, i32, i32) {
    %c0_i32 = arith.constant 0 : i32
    %c0_i32_0 = arith.constant 0 : i32
    return %arg0, %c0_i32, %arg1 : i32, i32, i32
  }
}

</mosaic_0001>

<bundles_post_ra>
// kernel: tpu_custom_call.1
= control target key start
LH: loop header
LB: loop body
LE: loop exit
PB: predicated region body
PF: predicated region fallthrough
CT: control target
= control target key end

     0   :  { %8 = vsyncpa [#allocation3], 0  ;;  %s697_s0 = inlined_call_operand.vmem [shape: f32[2,4,256], index: 0, kind: input, shape index: {}]   ;;  %s698_s1 = inlined_call_operand.vmem [shape: f32[24,4], index: 1, kind: input, shape index: {}]   ;;  %s699_s2 = inlined_call_operand.vmem [shape: f32[24,1], index: 2, kind: input, shape index: {}]   ;;  %s700_s3 = inlined_call_operand.hbm [shape: f32[2,24,256], index: 3, kind: output, shape index: {}]  }
   0x1   :  { %10 = vsyncpa [#allocation3 + $0x1], 0  ;;  %s582_s12 = smov 0   ;;  %s584_s13 = smov 0  }
   0x2   :  { %s586_s14 = smov 0   ;;  %s588_s15 = smov 0  }
   0x3   :  { %s590_s16 = smov 0   ;;  %s592_s17 = smov 0  }
   0x4 LB: > { %s396_s18 = sadd.s32 4294967295, %s557_s17   ;;  %s397_s19 = sadd.s32 4294967294, %s557_s17   ;;  %s557_s17 = sphi %s592_s17, %s16_s17   ;;  %s553_s16 = sphi %s590_s16, %s707_s16   ;;  %s549_s15 = sphi %s588_s15, %s706_s15   ;;  %s545_s14 = sphi %s586_s14, %s705_s14   ;;  %s541_s13 = sphi %s584_s13, %s704_s13   ;;  %s537_s12 = sphi %s582_s12, %s703_s12  }
   0x5   : > { %s28_s20 = sadd.s32 1, %s553_s16  ;;  %s107_s21 = sadd.s32 1, %s545_s14 }
   0x6   : > { %p30_p0 = scmp.ge.s32.totalorder %s28_s20, 2  ;;  %p117_p1 = scmp.ne.s32.totalorder %s545_s14, %s541_s13 }
   0x7   : > { %p118_p2 = scmp.eq.s32.totalorder %s396_s18, 1  ;;  %p123_p3 = scmp.ne.s32.totalorder %s541_s13, %s537_s12 }
   0x8   : > { %s709_s20 = smov (%p30_p0, %s28_s20), 0  ;;  %p124_p5 = scmp.eq.s32.totalorder %s397_s19, 1 }
   0x9   : > { %p622_p4 = por %p118_p2, %p117_p1  ;;  %s102_s23 = ssub.s32 %s553_s16, %s709_s20 }
   0xa   : > { %p400_p6 = scmp.ge.s32.totalorder %s557_s17, 1  ;;  %p105_p7 = scmp.eq.s32.totalorder %s102_s23, 0 }
   0xb   : > { %p629_p8 = por %p124_p5, %p123_p3  ;;  %p161_p9 = scmp.lt.s32.totalorder %s557_s17, 3 }
   0xc   : > { %s635_s25 = scalar_select %p105_p7, %s545_s14, %s107_s21  }
   0xd   : > { %p162_p10 = pnand %p400_p6, %p161_p9 }
   0xe   : > { %p190_p11 = scmp.lt.s32.totalorder (!%p162_p10), %s549_s15, 1  ;;  %s186_s26 = sand.u32 (!%p162_p10), 1, %s541_s13  }
   0xf   : > { %165 = sbr.rel (%p162_p10) target bundleno = 181 (0xb5), region = 32  ;;  %s499_s18 = scalar_lea.hbm (!%p162_p10), %s700_s3, 96 }
  0x10   : > { %s417_s27 = smul.u32 (!%p162_p10), 48, %s186_s26 }
  0x11   : > { %s418_s29 = smul.u32 (!%p162_p10), 48, %s549_s15 }
  0x13   : > { %s313_s5 = scalar_lea.hbm (!%p162_p10), %s700_s3, %s418_s29 }
  0x14   : > { %v559_v0 = vmov 0   ;;  %v203_v1 = vld [vmem:[%s699_s2] sm:$0xff]  ;;  %s191_s28 = scalar_select %p190_p11, %s549_s15, 1  ;;  %v205_v2 = vld [vmem:[%s699_s2 + $0x10] sm:$0xff]  ;;  %v204_v4 = vld [vmem:[%s699_s2 + $0x8] sm:$0xff]  ;;  %vm236_vm0 = vcmask 1043456  }
  0x15   : > { %477 = vset.pattern.permute.xlu0 %v559_v0  ;;  %478 = vset.pattern.permute.xlu1 %v559_v0  ;;  %v201_v5 = vld [vmem:[%s698_s1 + $0x8] sm:$0xff]  ;;  %vm226_vm1 = vcmask 31744   ;;  %v200_v8 = vld [vmem:[%s698_s1] sm:$0xff]  ;;  %v202_v9 = vld [vmem:[%s698_s1 + $0x10] sm:$0xff]  ;;  %s300_s15 = scalar_lea.sflag [#allocation3], %s186_s26 }
  0x16   : > { %209 = vperm.xlu0 %477, %v203_v1   ;;  %219 = vperm.xlu1 %478, %v205_v2   ;;  %s414_s4 = sshll.u32 %s191_s28, 3  ;;  %s188_s28 = scalar_lea.vmem [#allocation2], %s417_s27 }
  0x17   : > { %s197_s7 = scalar_lea.vmem %s697_s0, %s414_s4  ;;  %s314_s6 = sshll.u32 %s188_s28, 4  ;;  %s315_s6 = int_to_ptr.vmem [resolvable:$true] %s314_s6 }
  0x18   : > { %v206_v3 = vld [vmem:[%s197_s7] sm:$0xff]  ;;  %s316_s7 = sshll.u32 %s313_s5, 4  ;;  %s317_s7 = int_to_ptr.hbm [resolvable:$true] %s316_s7 }
  0x19   : > { %223 = vst [vmem:[#allocation1] ss:$2 sm:$0xff] %v206_v3  ;;  %s493_s8 = sshra.s32 %s317_s7, 4  ;;  %s494_s8 = int_to_ptr.hbm [resolvable:$true] %s493_s8 }
  0x1a   : > { %s495_s9 = scalar_lea.hbm %s494_s8, 48  ;;  %p500_p1 = scmp.lt.s32.totalorder %s494_s8, %s700_s3 }
  0x1b   : > { %p496_p12 = scmp.ne.s32.totalorder %s494_s8, %s495_s9  ;;  %p501_p2 = scmp.lt.s32.totalorder %s499_s18, %s495_s9 }
  0x1d   : > { %p497_p13 = pnand %p496_p12, %p622_p4  ;;  %p502_p3 = por %p501_p2, %p500_p1 }
  0x1e   : > { %214 = vperm.xlu0 %477, %v204_v4  }
  0x1f   : > { %p498_p0 = pneg %p497_p13 }
  0x20   : > { %v224_v6 = vld.sshfl [vmem:[#allocation1] sm:$0xff pattern:$0x75316420]  ;;  %v225_v7 = vld.sshfl [vmem:[#allocation1 + $0x8] sm:$0xff pattern:$0x75316420] }
  0x21   : > { %415 = vmatpush.msk.msra.mxu2 %vm236_vm0, %v224_v6  ;;  %416 = vmatpush.msk.msra.mxu3 %vm236_vm0, %v225_v7  ;;  %p503_p5 = pnand %p502_p3, %p498_p0 }
  0x22   : > { %405 = vmatmul.msk.f32.vlgmr.msra.gmra.mxu2 %vm226_vm1, %v201_v5  ;;  %409 = vmatmul.msk.f32.vlgmr.msra.gmra.mxu3 %vm226_vm1, %v201_v5 }
  0x23   : > { %403 = vmatpush.msk.msra.mxu0 %vm236_vm0, %v224_v6  ;;  %407 = vmatpush.msk.msra.mxu1 %vm236_vm0, %v225_v7 }
  0x24   : > { %404 = vmatmul.msk.f32.vlgmr.msra.gmra.mxu0 %vm226_vm1, %v200_v8  ;;  %408 = vmatmul.msk.f32.vlgmr.msra.gmra.mxu1 %vm226_vm1, %v200_v8 }
  0x2a   : > { %406 = vmatmul.msk.f32.gmra.mxu2 %vm226_vm1, %v202_v9  ;;  %410 = vmatmul.msk.f32.gmra.mxu3 %vm226_vm1, %v202_v9 }
  0x88   : > { %v210_v10 = vpop.permute.xlu0 %209  ;;  %v220_v20 = vpop.permute.xlu1 %219 }
  0x90   : > { %v215_v15 = vpop.permute.xlu0 %214 }
  0xa1   : > { %v258_v11 = vpop.f32.mrf.mxu0  ;;  %v284_v12 = vpop.f32.mrf.mxu1 }
  0xa2   : > { %v259_v13 = vadd.f32 %v258_v11, %v210_v10  ;;  %v285_v14 = vadd.f32 %v284_v12, %v210_v10 }
  0xa4   : > { %293 = vst [vmem:[%s188_s28] sm:$0xff] %v259_v13 }
  0xa5   : > { %v261_v16 = vpop.f32.mrf.mxu2  ;;  %294 = vst [vmem:[%s188_s28 + $0x8] sm:$0xff] %v285_v14  ;;  %v287_v17 = vpop.f32.mrf.mxu3 }
  0xa6   : > { %v262_v18 = vadd.f32 %v261_v16, %v215_v15  ;;  %v288_v19 = vadd.f32 %v287_v17, %v215_v15 }
  0xa8   : > { %295 = vst [vmem:[%s188_s28 + $0x10] sm:$0xff] %v262_v18 }
  0xa9   : > { %296 = vst [vmem:[%s188_s28 + $0x18] sm:$0xff] %v288_v19 }
  0xad   : > { %v264_v21 = vpop.f32.mrf.mxu2  ;;  %v290_v22 = vpop.f32.mrf.mxu3 }
  0xae   : > { %v265_v23 = vadd.f32 %v264_v21, %v220_v20  ;;  %v291_v24 = vadd.f32 %v290_v22, %v220_v20 }
  0xb0   : > { %297 = vst [vmem:[%s188_s28 + $0x20] sm:$0xff] %v265_v23 }
  0xb1   : > { %298 = vst [vmem:[%s188_s28 + $0x28] sm:$0xff] %v291_v24 }
  0xb2   : > { %506 = shalt.err (!%p503_p5)
}
  0xb3   : > { %s560_s23 = smov 256   ;;  %s561_s26 = smov 16  }
  0xb4   : > { %419 = dma.vmem_to_hbm [thread:$0]  (%p622_p4), %s315_s6, 768, %s317_s7, %s300_s15, %s560_s23, %s560_s23, %s561_s26  }
  0xb5 PF: > { %p425_p6 = scmp.ge.s32.totalorder %s557_s17, 2  ;;  %s331_s27 = sand.u32 1, %s537_s12  }
  0xb6   : > { %s332_s28 = scalar_lea.sflag [#allocation3], %s331_s27 }
  0xb7   : > { %p422_p7 = pnand %p425_p6, %p629_p8 }
  0xb9   : > { %p423_p9 = pneg %p422_p7 }
  0xbb   : > { %532 = dma.done.wait (%p423_p9), %s332_s28, 768  }
  0xbc   : > { %534 = vsyncadd (%p423_p9), %s332_s28, 4294966528  ;;  %s16_s17 = sadd.s32 1, %s557_s17   ;;  %s703_s12 = smov %s541_s13 }
  0xbd   : > { %p13_p10 = scmp.ge.s32.totalorder %s16_s17, 4   ;;  %s704_s13 = smov %s545_s14 }
  0xbe   : > { %s705_s14 = smov %s635_s25  ;;  %s706_s15 = smov %s553_s16 }
  0xbf   : > { %s707_s16 = smov %s709_s20  ;;  %15 = sbr.rel (!%p13_p10) target bundleno = 4 (0x4), region = 67 }
  0xc4   :  { %338 = vsyncpa [#allocation3], 1 }
  0xc5   :  { %340 = vsyncpa [#allocation3 + $0x1], 1 }

</bundles_post_ra>
